<compile_context>
chip_gen: v7x
topology: tpu7x:2x2x1
jax: 0.10.0
libtpu: 0.0.40
codegen_flags: <defaults>
</compile_context>

<pallas_src>
import functools

import jax
import jax.numpy as jnp
from jax import lax
from jax.experimental import pallas as pl
from jax.experimental.pallas import tpu as pltpu


def _round_up(x, m):
    return ((x + m - 1) // m) * m


def _vmem_bytes(tb, d, a_pad):
    """Conservative double-buffered VMEM footprint (f32 everywhere)."""
    f32 = 4
    x_bufs = 2 * tb * d * f32           # activation tile (double-buffered)
    w_bufs = 2 * a_pad * d * f32        # pinned weight (counted x2 to be safe)
    b_bufs = 2 * a_pad * 1 * f32
    out_bufs = 2 * 2 * a_pad * tb * f32  # two outputs, double-buffered
    return x_bufs + w_bufs + b_bufs + out_bufs


def _bernoulli_kernel(w_ref, b_ref, x_ref, logits_ref, probs_ref):
    # w_ref: (A_pad, D)  pinned
    # b_ref: (A_pad, 1)  pinned
    # x_ref: (tB, D)     gridded over batch
    # outputs: (A_pad, tB)  — batch on lanes, unmasked full-lane stores.
    raw = lax.dot_general(
        w_ref[...], x_ref[...],
        dimension_numbers=(((1,), (1,)), ((), ())),   # contract D with D -> (A_pad, tB)
        preferred_element_type=jnp.float32,
    )
    raw = raw + b_ref[...]                            # broadcast bias along batch lanes
    logits_ref[...] = raw
    # sigmoid(x) = 0.5 * tanh(0.5 * x) + 0.5  — EUP tanh + two cheap VPU FMAs,
    # no exp overflow, no f32 divide.
    probs_ref[...] = 0.5 * jnp.tanh(0.5 * raw) + 0.5


def prepare_params(w, b):
    """One-time parameter prep (do NOT call per step).

    w: (A, D) torch-layout Linear weight, b: (A,).
    Returns (w_pad, b_pad): (A_pad, D) and (A_pad, 1) with A_pad = round_up(A, 8).
    Padded rows are zero -> padded logits 0 / probs 0.5; they are sliced off by the
    forward wrapper.
    """
    A, D = w.shape
    a_pad = _round_up(max(A, 8), 8)
    w_p = jnp.asarray(w, jnp.float32)
    b_p = jnp.asarray(b, jnp.float32)
    if a_pad != A:
        w_p = jnp.pad(w_p, ((0, a_pad - A), (0, 0)))
        b_p = jnp.pad(b_p, (0, a_pad - A))
    return w_p, b_p.reshape(a_pad, 1)


@functools.partial(jax.jit, static_argnames=("num_outputs", "block_b"))
def bernoulli_forward(x, w_pad, b_pad, *, num_outputs, block_b=1024):
    """x: (B, D) f32; w_pad/b_pad from prepare_params.

    Returns (logits, probs), each (B, num_outputs) f32 — exactly the tensors backing
    the FixedBernoulli(logits=...) distribution of the original module.
    """
    B, D = x.shape
    A_pad = w_pad.shape[0]

    # Batch sits on the lane dim of the outputs -> round it to 128 for unmasked vst.
    B_lane = _round_up(B, 128)
    tB = min(_round_up(block_b, 128), B_lane)
    # Keep >=2 grid steps for larger batches so the "parallel" axis can split across
    # both TensorCores on v7x.
    if B_lane >= 256 and tB == B_lane:
        tB = _round_up(B_lane // 2, 128)
    # Shrink the tile until the double-buffered footprint is comfortably small on
    # every generation (v7x has only 64 MiB physical VMEM per TC).
    while tB > 128 and _vmem_bytes(tB, D, A_pad) > (40 << 20):
        tB = _round_up(tB // 2, 128)
    B_pad = _round_up(B_lane, tB)

    x_p = jnp.pad(x, ((0, B_pad - B), (0, 0))) if B_pad != B else x

    grid = (B_pad // tB,)
    out_shapes = (
        jax.ShapeDtypeStruct((A_pad, B_pad), jnp.float32),   # logits^T
        jax.ShapeDtypeStruct((A_pad, B_pad), jnp.float32),   # probs^T
    )

    cost = pl.CostEstimate(
        flops=2 * B_pad * D * A_pad + 3 * A_pad * B_pad,
        transcendentals=A_pad * B_pad,
        bytes_accessed=4 * (B_pad * D + A_pad * D + A_pad + 2 * A_pad * B_pad),
    )

    # Only request a VMEM limit when the footprint exceeds the smallest scoped
    # default (v5e: 16 MiB); cap at 48 MiB so v7x (64 MiB physical) keeps headroom.
    need = _vmem_bytes(tB, D, A_pad)
    vmem_limit = None
    if need > (16 << 20):
        vmem_limit = min(48 << 20, _round_up(need + (4 << 20), 1 << 20))

    logits_t, probs_t = pl.pallas_call(
        _bernoulli_kernel,
        out_shape=out_shapes,
        grid=grid,
        in_specs=[
            pl.BlockSpec((A_pad, D), lambda i: (0, 0)),   # W: pinned
            pl.BlockSpec((A_pad, 1), lambda i: (0, 0)),   # b: pinned
            pl.BlockSpec((tB, D), lambda i: (i, 0)),      # x: gridded over batch
        ],
        out_specs=(
            pl.BlockSpec((A_pad, tB), lambda i: (0, i)),
            pl.BlockSpec((A_pad, tB), lambda i: (0, i)),
        ),
        compiler_params=pltpu.CompilerParams(
            dimension_semantics=("parallel",),
            vmem_limit_bytes=vmem_limit,
        ),
        cost_estimate=cost,
    )(w_pad, b_pad, x_p)

    # Layout plumbing back to the (B, A) convention of the PyTorch module
    # (single fused slice+transpose; no extra kernel traffic).
    logits = logits_t[:num_outputs, :B].T
    probs = probs_t[:num_outputs, :B].T
    return logits, probs


def orthogonal_init(key, shape, gain=1.0):
    """Deterministic orthogonal init matching nn.init.orthogonal_ semantics."""
    rows, cols = shape
    n = max(rows, cols)
    a = jax.random.normal(key, (n, n), dtype=jnp.float32)
    q, r = jnp.linalg.qr(a)
    q = q * jnp.sign(jnp.diag(r))        # make decomposition unique
    return gain * q[:rows, :cols]


if __name__ == "__main__":
    num_inputs = 32
    num_outputs = 16
    batch = 8

    key = jax.random.PRNGKey(0)
    k_w, k_x = jax.random.split(key)

    # Parameters per Bernoulli.__init__: Linear(num_inputs, num_outputs),
    # orthogonal weight (default gain=1), zero bias.
    w = orthogonal_init(k_w, (num_outputs, num_inputs))      # (A, D), torch layout
    b = jnp.zeros((num_outputs,), dtype=jnp.float32)
    x = jax.random.normal(k_x, (batch, num_inputs), dtype=jnp.float32)

    # One-time parameter prep (outside the hot path).
    w_pad, b_pad = prepare_params(w, b)

    logits, probs = bernoulli_forward(x, w_pad, b_pad, num_outputs=num_outputs)
    jax.block_until_ready((logits, probs))

    # Reference check in plain JAX.
    ref_logits = x @ w.T + b
    ref_probs = jax.nn.sigmoid(ref_logits)

    assert logits.shape == (batch, num_outputs)
    assert probs.shape == (batch, num_outputs)
    assert jnp.allclose(logits, ref_logits, atol=1e-5, rtol=1e-5)
    assert jnp.allclose(probs, ref_probs, atol=1e-5, rtol=1e-5)
    # FixedBernoulli.mode() == (probs > 0.5), entropy/log_probs/sample are
    # post-forward distribution methods trivially derived from (logits, probs).
    # TODO(synk): those distribution methods are left to plain XLA glue on top of
    # the kernel outputs.

    print("KERNEL_OK")
</pallas_src>

<mosaic_0001>
module attributes {stable_mosaic.version = 11 : i64} {
  func.func @_bernoulli_kernel(%arg0: i32, %arg1: memref<16x32xf32, #tpu.memory_space<vmem>>, %arg2: memref<16x1xf32, #tpu.memory_space<vmem>>, %arg3: memref<128x32xf32, #tpu.memory_space<vmem>>, %arg4: memref<16x128xf32, #tpu.memory_space<vmem>>, %arg5: memref<16x128xf32, #tpu.memory_space<vmem>>) attributes {dimension_semantics = [#tpu.dimension_semantics<parallel>], iteration_bounds = array<i64: 1>, scalar_prefetch = 0 : i64, scratch_operands = 0 : i64, tpu.core_type = #tpu.core_type<tc>, window_params = [{pipeline_mode = #tpu.pipeline_mode<synchronous>, transform_indices = @transform_0, window_bounds = array<i64: 16, 32>}, {pipeline_mode = #tpu.pipeline_mode<synchronous>, transform_indices = @transform_1, window_bounds = array<i64: 16, 1>}, {transform_indices = @transform_2, window_bounds = array<i64: 128, 32>}, {transform_indices = @transform_3, window_bounds = array<i64: 16, 128>}, {transform_indices = @transform_4, window_bounds = array<i64: 16, 128>}]} {
    %c0 = arith.constant 0 : index
    %c0_0 = arith.constant 0 : index
    %0 = vector.load %arg1[%c0, %c0_0] : memref<16x32xf32, #tpu.memory_space<vmem>>, vector<16x32xf32>
    %c0_1 = arith.constant 0 : index
    %c0_2 = arith.constant 0 : index
    %1 = vector.load %arg3[%c0_1, %c0_2] : memref<128x32xf32, #tpu.memory_space<vmem>>, vector<128x32xf32>
    %cst = arith.constant dense<0.000000e+00> : vector<16x128xf32>
    %2 = tpu.matmul %0, %1, %cst {dimension_numbers = #tpu.dot_dimension_numbers<[1], [1], [0], [0], [0, 0, 1, 0], [], []>} : vector<16x32xf32>, vector<128x32xf32>, vector<16x128xf32> -> vector<16x128xf32>
    %c0_3 = arith.constant 0 : index
    %c0_4 = arith.constant 0 : index
    %3 = vector.load %arg2[%c0_3, %c0_4] : memref<16x1xf32, #tpu.memory_space<vmem>>, vector<16x1xf32>
    %4 = vector.broadcast %3 : vector<16x1xf32> to vector<16x128xf32>
    %5 = arith.addf %2, %4 : vector<16x128xf32>
    %c0_5 = arith.constant 0 : index
    %c0_6 = arith.constant 0 : index
    %6 = vector.load %arg4[%c0_5, %c0_6] : memref<16x128xf32, #tpu.memory_space<vmem>>, vector<16x128xf32>
    tpu.vector_store %arg4[%c0_5, %c0_6], %5 {strides = array<i32>} : memref<16x128xf32, #tpu.memory_space<vmem>>, vector<16x128xf32>,
    %cst_7 = arith.constant 5.000000e-01 : f32
    %7 = vector.broadcast %cst_7 : f32 to vector<16x128xf32>
    %8 = arith.mulf %7, %5 : vector<16x128xf32>
    %9 = math.tanh %8 : vector<16x128xf32>
    %cst_8 = arith.constant 5.000000e-01 : f32
    %10 = vector.broadcast %cst_8 : f32 to vector<16x128xf32>
    %11 = arith.mulf %10, %9 : vector<16x128xf32>
    %cst_9 = arith.constant 5.000000e-01 : f32
    %12 = vector.broadcast %cst_9 : f32 to vector<16x128xf32>
    %13 = arith.addf %11, %12 : vector<16x128xf32>
    %c0_10 = arith.constant 0 : index
    %c0_11 = arith.constant 0 : index
    %14 = vector.load %arg5[%c0_10, %c0_11] : memref<16x128xf32, #tpu.memory_space<vmem>>, vector<16x128xf32>
    tpu.vector_store %arg5[%c0_10, %c0_11], %13 {strides = array<i32>} : memref<16x128xf32, #tpu.memory_space<vmem>>, vector<16x128xf32>,
    return
  }
  func.func @transform_0(%arg0: i32) -> (i32, i32) {
    %c0_i32 = arith.constant 0 : i32
    %c0_i32_0 = arith.constant 0 : i32
    %c0_i32_1 = arith.constant 0 : i32
    return %c0_i32, %c0_i32_0 : i32, i32
  }
  func.func @transform_1(%arg0: i32) -> (i32, i32) {
    %c0_i32 = arith.constant 0 : i32
    %c0_i32_0 = arith.constant 0 : i32
    %c0_i32_1 = arith.constant 0 : i32
    return %c0_i32, %c0_i32_0 : i32, i32
  }
  func.func @transform_2(%arg0: i32) -> (i32, i32) {
    %c0_i32 = arith.constant 0 : i32
    %c0_i32_0 = arith.constant 0 : i32
    return %arg0, %c0_i32 : i32, i32
  }
  func.func @transform_3(%arg0: i32) -> (i32, i32) {
    %c0_i32 = arith.constant 0 : i32
    %c0_i32_0 = arith.constant 0 : i32
    return %c0_i32, %arg0 : i32, i32
  }
  func.func @transform_4(%arg0: i32) -> (i32, i32) {
    %c0_i32 = arith.constant 0 : i32
    %c0_i32_0 = arith.constant 0 : i32
    return %c0_i32, %arg0 : i32, i32
  }
}

</mosaic_0001>

<bundles_post_ra>
// kernel: bernoulli_forward.1
= control target key start
LH: loop header
LB: loop body
LE: loop exit
PB: predicated region body
PF: predicated region fallthrough
CT: control target
= control target key end

     0   :  { %vm46_vm0 = vcmask 261120   ;;  %v321_v3 = vmov 0   ;;  %s459_s2 = inlined_call_operand.vmem [shape: f32[128,32], index: 2, kind: input, shape index: {}]   ;;  %s460_s0 = inlined_call_operand.vmem [shape: f32[16,32], index: 0, kind: input, shape index: {}]   ;;  %s461_s1 = inlined_call_operand.vmem [shape: f32[16,1], index: 1, kind: input, shape index: {}]   ;;  %s462_s3 = inlined_call_operand.vmem [shape: f32[16,128], index: 3, kind: output, shape index: {0}]   ;;  %s463_s4 = inlined_call_operand.vmem [shape: f32[16,128], index: 4, kind: output, shape index: {1}]  }
   0x1   :  { %v18_v0 = vld [vmem:[%s459_s2] sm:$0xff]  ;;  %v19_v1 = vld [vmem:[%s459_s2 + $0x8] sm:$0xff]  ;;  %vm355_vm1 = vmpackc.low %vm46_vm0, %vm46_vm0  ;;  %316 = vset.pattern.permute.xlu0 %v321_v3 }
   0x2   :  { %v267_v4 = vpack.c.bf16 %v19_v1, %v18_v0  ;;  %v20_v5 = vld [vmem:[%s459_s2 + $0x10] sm:$0xff]  ;;  %v21_v6 = vld [vmem:[%s459_s2 + $0x18] sm:$0xff]  ;;  %v16_v8 = vld [vmem:[%s460_s0] sm:$0xff] }
   0x3   :  { %v273_v7 = vpack.c.bf16 %v21_v6, %v20_v5  ;;  %v22_v9 = vld [vmem:[%s459_s2 + $0x20] sm:$0xff]  ;;  %v23_v10 = vld [vmem:[%s459_s2 + $0x28] sm:$0xff]  ;;  %264 = vmatprep.mubr.msk.f32.mxu0 %vm46_vm0, %v16_v8  ;;  %v24_v14 = vld [vmem:[%s459_s2 + $0x30] sm:$0xff] }
   0x4   :  { %269 = vmatprep.subr.msk.bf16.mxu0 %vm355_vm1, %v267_v4  ;;  %v34_v11 = vld [vmem:[%s461_s1] sm:$0xff]  ;;  %v35_v12 = vld [vmem:[%s461_s1 + $0x8] sm:$0xff]  ;;  %v279_v13 = vpack.c.bf16 %v23_v10, %v22_v9  ;;  %v25_v15 = vld [vmem:[%s459_s2 + $0x38] sm:$0xff] }
   0x5   :  { %272 = vmatpush3.bf16.xpose.msk.msra.mxu0 %vm355_vm1, %v267_v4  ;;  %38 = vperm.xlu0 %316, %v34_v11   ;;  %v285_v16 = vpack.c.bf16 %v25_v15, %v24_v14  ;;  %v26_v17 = vld [vmem:[%s459_s2 + $0x40] sm:$0xff]  ;;  %v27_v18 = vld [vmem:[%s459_s2 + $0x48] sm:$0xff]  ;;  %v28_v20 = vld [vmem:[%s459_s2 + $0x50] sm:$0xff] }
   0x6   :  { %275 = vmatprep.subr.msk.bf16.mxu0 %vm355_vm1, %v273_v7  ;;  %v291_v19 = vpack.c.bf16 %v27_v18, %v26_v17  ;;  %v29_v21 = vld [vmem:[%s459_s2 + $0x58] sm:$0xff]  ;;  %v30_v23 = vld [vmem:[%s459_s2 + $0x60] sm:$0xff]  ;;  %v31_v24 = vld [vmem:[%s459_s2 + $0x68] sm:$0xff] }
   0x7   :  { %v297_v22 = vpack.c.bf16 %v29_v21, %v28_v20  ;;  %v303_v25 = vpack.c.bf16 %v31_v24, %v30_v23  ;;  %v32_v26 = vld [vmem:[%s459_s2 + $0x70] sm:$0xff]  ;;  %v33_v27 = vld [vmem:[%s459_s2 + $0x78] sm:$0xff]  ;;  %v17_v29 = vld [vmem:[%s460_s0 + $0x8] sm:$0xff] }
   0x8   :  { %v309_v28 = vpack.c.bf16 %v33_v27, %v32_v26 }
   0x9   :  { %43 = vperm.xlu0 %316, %v35_v12  }
   0xd   :  { %278 = vmatpush3.bf16.xpose.msk.msra.mxu0 %vm355_vm1, %v273_v7 }
   0xe   :  { %281 = vmatprep.subr.msk.bf16.mxu0 %vm355_vm1, %v279_v13 }
  0x15   :  { %284 = vmatpush3.bf16.xpose.msk.msra.mxu0 %vm355_vm1, %v279_v13 }
  0x16   :  { %287 = vmatprep.subr.msk.bf16.mxu0 %vm355_vm1, %v285_v16 }
  0x1d   :  { %290 = vmatpush3.bf16.xpose.msk.msra.mxu0 %vm355_vm1, %v285_v16 }
  0x1e   :  { %293 = vmatprep.subr.msk.bf16.mxu0 %vm355_vm1, %v291_v19 }
  0x25   :  { %296 = vmatpush3.bf16.xpose.msk.msra.mxu0 %vm355_vm1, %v291_v19 }
  0x26   :  { %299 = vmatprep.subr.msk.bf16.mxu0 %vm355_vm1, %v297_v22 }
  0x2d   :  { %302 = vmatpush3.bf16.xpose.msk.msra.mxu0 %vm355_vm1, %v297_v22 }
  0x2e   :  { %305 = vmatprep.subr.msk.bf16.mxu0 %vm355_vm1, %v303_v25 }
  0x35   :  { %308 = vmatpush3.bf16.xpose.msk.msra.mxu0 %vm355_vm1, %v303_v25 }
  0x36   :  { %311 = vmatprep.subr.msk.bf16.mxu0 %vm355_vm1, %v309_v28 }
  0x3d   :  { %314 = vmatpush3.bf16.xpose.msk.msra.mxu0 %vm355_vm1, %v309_v28 }
  0x44   :  { %265 = vmatmul.mubr.msk.f32.vlgmr.msra.gmra.mrb[0].mxu0 %vm46_vm0, %v17_v29 }
  0x84   :  { %v39_v30 = vpop.permute.xlu0 %38 }
  0x88   :  { %v44_v31 = vpop.permute.xlu0 %43 }
 0x117   :  { %v266_v32 = vpop.f32.mrb[0].mxu0 }
 0x118   :  { %v173_v33 = vadd.f32 %v266_v32, %v44_v31  ;;  %v167_v34 = vpop.f32.mrb[1].mxu0 }
 0x119   :  { %v168_v35 = vadd.f32 %v167_v34, %v39_v30 }
 0x11a   :  { %177 = vst [vmem:[%s462_s3 + $0x8] sm:$0xff] %v173_v33  ;;  %v179_v36 = vmul.f32 0.5, %v173_v33 }
 0x11b   :  { %176 = vst [vmem:[%s462_s3] sm:$0xff] %v168_v35  ;;  %v178_v37 = vmul.f32 0.5, %v168_v35 }
 0x11c   :  { %317 = vtanh.f32 %v179_v36 }
 0x11d   :  { %319 = vtanh.f32 %v178_v37 }
 0x126   :  { %v318_v38 = vpop.eup %317 }
 0x127   :  { %v320_v39 = vpop.eup %319  ;;  %v183_v40 = vmul.f32 0.5, %v318_v38 }
 0x128   :  { %v182_v41 = vmul.f32 0.5, %v320_v39 }
 0x129   :  { %v185_v42 = vadd.f32 0.5, %v183_v40 }
 0x12a   :  { %v184_v43 = vadd.f32 0.5, %v182_v41 }
 0x12b   :  { %187 = vst [vmem:[%s463_s4 + $0x8] sm:$0xff] %v185_v42 }
 0x12c   :  { %186 = vst [vmem:[%s463_s4] sm:$0xff] %v184_v43 }

</bundles_post_ra>
